<compile_context>
chip_gen: v7x
topology: tpu7x:2x2x1
jax: 0.10.0
libtpu: 0.0.40
codegen_flags: <defaults>
</compile_context>

<pallas_src>
import functools

import jax
import jax.numpy as jnp
from jax.experimental import pallas as pl
from jax.experimental.pallas import tpu as pltpu

SUBLANE = 8
MAX_BATCH_TILE = 2048  # rows per grid step; tiny feature dims -> still <1 MiB VMEM


def _round_up(n, m):
    return ((n + m - 1) // m) * m


def _cdiv(a, b):
    return (a + b - 1) // b


def actor_kernel(x_ref, w1_ref, b1_ref, w2_ref, b2_ref, w3_ref, b3_ref,
                 wo_ref, bo_ref, ma_ref, out_ref):
    """One batch tile: 4-layer MLP; weights VMEM-resident; fp32 MXU accumulation."""
    cdt = w1_ref.dtype  # matmul operand dtype (f32, or bf16 on the fast path)

    h = jnp.dot(x_ref[...].astype(cdt), w1_ref[...],
                preferred_element_type=jnp.float32)
    h = jnp.maximum(h + b1_ref[...], 0.0)

    h = jnp.dot(h.astype(cdt), w2_ref[...], preferred_element_type=jnp.float32)
    h = jnp.maximum(h + b2_ref[...], 0.0)

    h = jnp.dot(h.astype(cdt), w3_ref[...], preferred_element_type=jnp.float32)
    h = jnp.maximum(h + b3_ref[...], 0.0)

    a = jnp.dot(h.astype(cdt), wo_ref[...], preferred_element_type=jnp.float32)
    a = a + bo_ref[...]
    # ma_ref is (1,1) f32 -> broadcast multiply; tanh goes to the EUP slot.
    out_ref[...] = (ma_ref[...] * jnp.tanh(a)).astype(out_ref.dtype)


@functools.partial(jax.jit, static_argnames=("batch_tile",))
def actor_forward(x, params, max_action, *, batch_tile=MAX_BATCH_TILE):
    """x: [B, obs+goal] -> actions: [B, action] (float32)."""
    w1, b1, w2, b2, w3, b3, wo, bo = params
    B, in_dim = x.shape
    hidden = w1.shape[1]
    act_dim = wo.shape[1]

    # --- batch tiling: minimal padding; even tile count balances v7x's 2 TCs ---
    n_tiles = max(1, _cdiv(B, batch_tile))
    if n_tiles > 1 and n_tiles % 2 == 1:
        n_tiles += 1
    TB = _round_up(_cdiv(B, n_tiles), SUBLANE)
    Bp = n_tiles * TB

    xp = x if Bp == B else jnp.pad(x, ((0, Bp - B), (0, 0)))
    ma = jnp.asarray(max_action, jnp.float32).reshape(1, 1)

    def resident(arr):
        # Full-extent block, same block index every step -> DMA'd once, stays in VMEM.
        return pl.BlockSpec(arr.shape, lambda i: (0,) * arr.ndim)

    flops = 2 * Bp * (in_dim * hidden + 2 * hidden * hidden + hidden * act_dim)
    bytes_accessed = (
        Bp * in_dim * x.dtype.itemsize + Bp * act_dim * 4
        + sum(int(a.size) * a.dtype.itemsize
              for a in (w1, b1, w2, b2, w3, b3, wo, bo)))
    cost = pl.CostEstimate(flops=flops, transcendentals=Bp * act_dim,
                           bytes_accessed=bytes_accessed)

    out_p = pl.pallas_call(
        actor_kernel,
        out_shape=jax.ShapeDtypeStruct((Bp, act_dim), jnp.float32),
        grid=(n_tiles,),
        in_specs=[
            pl.BlockSpec((TB, in_dim), lambda i: (i, 0)),   # x: tiled on batch only
            resident(w1), resident(b1),
            resident(w2), resident(b2),
            resident(w3), resident(b3),
            resident(wo), resident(bo),
            resident(ma),
        ],
        out_specs=pl.BlockSpec((TB, act_dim), lambda i: (i, 0)),
        compiler_params=pltpu.CompilerParams(
            dimension_semantics=("parallel",)),
        cost_estimate=cost,
    )(xp, w1, b1, w2, b2, w3, b3, wo, bo, ma)

    return out_p if Bp == B else out_p[:B]


def cast_params(params, dtype):
    """Optional bf16 fast path for v6e/v7x: cast once, reuse across calls."""
    return tuple(p.astype(dtype) for p in params)


def init_params(key, in_dim, hidden, act_dim):
    """Deterministic synthetic init (shapes match the PyTorch module)."""
    ks = jax.random.split(key, 8)

    def lin(kw, kb, fan_in, fan_out):
        bound = 1.0 / jnp.sqrt(fan_in)
        w = jax.random.uniform(kw, (fan_in, fan_out), jnp.float32, -bound, bound)
        b = jax.random.uniform(kb, (1, fan_out), jnp.float32, -bound, bound)
        return w, b

    w1, b1 = lin(ks[0], ks[1], in_dim, hidden)
    w2, b2 = lin(ks[2], ks[3], hidden, hidden)
    w3, b3 = lin(ks[4], ks[5], hidden, hidden)
    wo, bo = lin(ks[6], ks[7], hidden, act_dim)
    return (w1, b1, w2, b2, w3, b3, wo, bo)


def reference_forward(x, params, max_action):
    w1, b1, w2, b2, w3, b3, wo, bo = params
    h = jax.nn.relu(x @ w1 + b1)
    h = jax.nn.relu(h @ w2 + b2)
    h = jax.nn.relu(h @ w3 + b3)
    return max_action * jnp.tanh(h @ wo + bo)


if __name__ == "__main__":
    # env_params (small, consistent with the module):
    obs, goal, hidden, action = 10, 3, 32, 4
    max_action = 1.0
    batch = 2

    key = jax.random.PRNGKey(0)
    k_x, k_p = jax.random.split(key)
    x = jax.random.normal(k_x, (batch, obs + goal), dtype=jnp.float32)
    params = init_params(k_p, obs + goal, hidden, action)
    ref = reference_forward(x, params, max_action)

    # 1) small-batch fp32 path (typical RL actor step)
    actions = jax.block_until_ready(actor_forward(x, params, max_action))
    assert actions.shape == (batch, action)
    assert jnp.allclose(actions, ref, atol=1e-5, rtol=1e-5)

    # 2) large batch with multiple grid steps + batch padding (batch_tile=256 ->
    #    6 even tiles of 176 rows for B=1040)
    big_B = 1040
    xb = jax.random.normal(jax.random.PRNGKey(1), (big_B, obs + goal), jnp.float32)
    out_big = jax.block_until_ready(
        actor_forward(xb, params, max_action, batch_tile=256))
    ref_big = reference_forward(xb, params, max_action)
    assert out_big.shape == (big_B, action)
    assert jnp.allclose(out_big, ref_big, atol=1e-5, rtol=1e-5)

    # 3) bf16 operand path (native bf16 MXU on v6e/v7x), fp32 accumulation.
    params_bf16 = cast_params(params, jnp.bfloat16)
    out_bf16 = jax.block_until_ready(
        actor_forward(xb.astype(jnp.bfloat16), params_bf16, max_action,
                      batch_tile=256))
    assert out_bf16.shape == (big_B, action)
    assert jnp.allclose(out_bf16, ref_big, atol=5e-2, rtol=5e-2)

    print("KERNEL_OK")
</pallas_src>

<mosaic_0001>
module attributes {stable_mosaic.version = 11 : i64} {
  func.func @actor_kernel(%arg0: i32, %arg1: memref<8x13xf32, #tpu.memory_space<vmem>>, %arg2: memref<13x32xf32, #tpu.memory_space<vmem>>, %arg3: memref<1x32xf32, #tpu.memory_space<vmem>>, %arg4: memref<32x32xf32, #tpu.memory_space<vmem>>, %arg5: memref<1x32xf32, #tpu.memory_space<vmem>>, %arg6: memref<32x32xf32, #tpu.memory_space<vmem>>, %arg7: memref<1x32xf32, #tpu.memory_space<vmem>>, %arg8: memref<32x4xf32, #tpu.memory_space<vmem>>, %arg9: memref<1x4xf32, #tpu.memory_space<vmem>>, %arg10: memref<1x1xf32, #tpu.memory_space<vmem>>, %arg11: memref<8x4xf32, #tpu.memory_space<vmem>>) attributes {dimension_semantics = [#tpu.dimension_semantics<parallel>], iteration_bounds = array<i64: 1>, scalar_prefetch = 0 : i64, scratch_operands = 0 : i64, tpu.core_type = #tpu.core_type<tc>, window_params = [{transform_indices = @transform_0, window_bounds = array<i64: 8, 13>}, {pipeline_mode = #tpu.pipeline_mode<synchronous>, transform_indices = @transform_1, window_bounds = array<i64: 13, 32>}, {pipeline_mode = #tpu.pipeline_mode<synchronous>, transform_indices = @transform_2, window_bounds = array<i64: 1, 32>}, {pipeline_mode = #tpu.pipeline_mode<synchronous>, transform_indices = @transform_3, window_bounds = array<i64: 32, 32>}, {pipeline_mode = #tpu.pipeline_mode<synchronous>, transform_indices = @transform_4, window_bounds = array<i64: 1, 32>}, {pipeline_mode = #tpu.pipeline_mode<synchronous>, transform_indices = @transform_5, window_bounds = array<i64: 32, 32>}, {pipeline_mode = #tpu.pipeline_mode<synchronous>, transform_indices = @transform_6, window_bounds = array<i64: 1, 32>}, {pipeline_mode = #tpu.pipeline_mode<synchronous>, transform_indices = @transform_7, window_bounds = array<i64: 32, 4>}, {pipeline_mode = #tpu.pipeline_mode<synchronous>, transform_indices = @transform_8, window_bounds = array<i64: 1, 4>}, {pipeline_mode = #tpu.pipeline_mode<synchronous>, transform_indices = @transform_9, window_bounds = array<i64: 1, 1>}, {transform_indices = @transform_10, window_bounds = array<i64: 8, 4>}]} {
    %c0 = arith.constant 0 : index
    %c0_0 = arith.constant 0 : index
    %0 = vector.load %arg1[%c0, %c0_0] : memref<8x13xf32, #tpu.memory_space<vmem>>, vector<8x13xf32>
    %c0_1 = arith.constant 0 : index
    %c0_2 = arith.constant 0 : index
    %1 = vector.load %arg2[%c0_1, %c0_2] : memref<13x32xf32, #tpu.memory_space<vmem>>, vector<13x32xf32>
    %cst = arith.constant dense<0.000000e+00> : vector<8x32xf32>
    %2 = tpu.matmul %0, %1, %cst {dimension_numbers = #tpu.dot_dimension_numbers<[1], [0], [0], [1], [0, 0, 1, 1], [], []>} : vector<8x13xf32>, vector<13x32xf32>, vector<8x32xf32> -> vector<8x32xf32>
    %c0_3 = arith.constant 0 : index
    %c0_4 = arith.constant 0 : index
    %3 = vector.load %arg3[%c0_3, %c0_4] : memref<1x32xf32, #tpu.memory_space<vmem>>, vector<1x32xf32>
    %4 = vector.broadcast %3 : vector<1x32xf32> to vector<8x32xf32>
    %5 = arith.addf %2, %4 : vector<8x32xf32>
    %cst_5 = arith.constant 0.000000e+00 : f32
    %6 = vector.broadcast %cst_5 : f32 to vector<8x32xf32>
    %7 = arith.maximumf %5, %6 : vector<8x32xf32>
    %c0_6 = arith.constant 0 : index
    %c0_7 = arith.constant 0 : index
    %8 = vector.load %arg4[%c0_6, %c0_7] : memref<32x32xf32, #tpu.memory_space<vmem>>, vector<32x32xf32>
    %cst_8 = arith.constant dense<0.000000e+00> : vector<8x32xf32>
    %9 = tpu.matmul %7, %8, %cst_8 {dimension_numbers = #tpu.dot_dimension_numbers<[1], [0], [0], [1], [0, 0, 1, 1], [], []>} : vector<8x32xf32>, vector<32x32xf32>, vector<8x32xf32> -> vector<8x32xf32>
    %c0_9 = arith.constant 0 : index
    %c0_10 = arith.constant 0 : index
    %10 = vector.load %arg5[%c0_9, %c0_10] : memref<1x32xf32, #tpu.memory_space<vmem>>, vector<1x32xf32>
    %11 = vector.broadcast %10 : vector<1x32xf32> to vector<8x32xf32>
    %12 = arith.addf %9, %11 : vector<8x32xf32>
    %cst_11 = arith.constant 0.000000e+00 : f32
    %13 = vector.broadcast %cst_11 : f32 to vector<8x32xf32>
    %14 = arith.maximumf %12, %13 : vector<8x32xf32>
    %c0_12 = arith.constant 0 : index
    %c0_13 = arith.constant 0 : index
    %15 = vector.load %arg6[%c0_12, %c0_13] : memref<32x32xf32, #tpu.memory_space<vmem>>, vector<32x32xf32>
    %cst_14 = arith.constant dense<0.000000e+00> : vector<8x32xf32>
    %16 = tpu.matmul %14, %15, %cst_14 {dimension_numbers = #tpu.dot_dimension_numbers<[1], [0], [0], [1], [0, 0, 1, 1], [], []>} : vector<8x32xf32>, vector<32x32xf32>, vector<8x32xf32> -> vector<8x32xf32>
    %c0_15 = arith.constant 0 : index
    %c0_16 = arith.constant 0 : index
    %17 = vector.load %arg7[%c0_15, %c0_16] : memref<1x32xf32, #tpu.memory_space<vmem>>, vector<1x32xf32>
    %18 = vector.broadcast %17 : vector<1x32xf32> to vector<8x32xf32>
    %19 = arith.addf %16, %18 : vector<8x32xf32>
    %cst_17 = arith.constant 0.000000e+00 : f32
    %20 = vector.broadcast %cst_17 : f32 to vector<8x32xf32>
    %21 = arith.maximumf %19, %20 : vector<8x32xf32>
    %c0_18 = arith.constant 0 : index
    %c0_19 = arith.constant 0 : index
    %22 = vector.load %arg8[%c0_18, %c0_19] : memref<32x4xf32, #tpu.memory_space<vmem>>, vector<32x4xf32>
    %cst_20 = arith.constant dense<0.000000e+00> : vector<8x4xf32>
    %23 = tpu.matmul %21, %22, %cst_20 {dimension_numbers = #tpu.dot_dimension_numbers<[1], [0], [0], [1], [0, 0, 1, 1], [], []>} : vector<8x32xf32>, vector<32x4xf32>, vector<8x4xf32> -> vector<8x4xf32>
    %c0_21 = arith.constant 0 : index
    %c0_22 = arith.constant 0 : index
    %24 = vector.load %arg9[%c0_21, %c0_22] : memref<1x4xf32, #tpu.memory_space<vmem>>, vector<1x4xf32>
    %25 = vector.broadcast %24 : vector<1x4xf32> to vector<8x4xf32>
    %26 = arith.addf %23, %25 : vector<8x4xf32>
    %c0_23 = arith.constant 0 : index
    %c0_24 = arith.constant 0 : index
    %27 = vector.load %arg10[%c0_23, %c0_24] : memref<1x1xf32, #tpu.memory_space<vmem>>, vector<1x1xf32>
    %28 = math.tanh %26 : vector<8x4xf32>
    %29 = vector.broadcast %27 : vector<1x1xf32> to vector<8x4xf32>
    %30 = arith.mulf %29, %28 : vector<8x4xf32>
    %c0_25 = arith.constant 0 : index
    %c0_26 = arith.constant 0 : index
    %31 = vector.load %arg11[%c0_25, %c0_26] : memref<8x4xf32, #tpu.memory_space<vmem>>, vector<8x4xf32>
    tpu.vector_store %arg11[%c0_25, %c0_26], %30 {strides = array<i32>} : memref<8x4xf32, #tpu.memory_space<vmem>>, vector<8x4xf32>,
    return
  }
  func.func @transform_0(%arg0: i32) -> (i32, i32) {
    %c0_i32 = arith.constant 0 : i32
    %c0_i32_0 = arith.constant 0 : i32
    return %arg0, %c0_i32 : i32, i32
  }
  func.func @transform_1(%arg0: i32) -> (i32, i32) {
    %c0_i32 = arith.constant 0 : i32
    %c0_i32_0 = arith.constant 0 : i32
    %c0_i32_1 = arith.constant 0 : i32
    return %c0_i32, %c0_i32_0 : i32, i32
  }
  func.func @transform_2(%arg0: i32) -> (i32, i32) {
    %c0_i32 = arith.constant 0 : i32
    %c0_i32_0 = arith.constant 0 : i32
    %c0_i32_1 = arith.constant 0 : i32
    return %c0_i32, %c0_i32_0 : i32, i32
  }
  func.func @transform_3(%arg0: i32) -> (i32, i32) {
    %c0_i32 = arith.constant 0 : i32
    %c0_i32_0 = arith.constant 0 : i32
    %c0_i32_1 = arith.constant 0 : i32
    return %c0_i32, %c0_i32_0 : i32, i32
  }
  func.func @transform_4(%arg0: i32) -> (i32, i32) {
    %c0_i32 = arith.constant 0 : i32
    %c0_i32_0 = arith.constant 0 : i32
    %c0_i32_1 = arith.constant 0 : i32
    return %c0_i32, %c0_i32_0 : i32, i32
  }
  func.func @transform_5(%arg0: i32) -> (i32, i32) {
    %c0_i32 = arith.constant 0 : i32
    %c0_i32_0 = arith.constant 0 : i32
    %c0_i32_1 = arith.constant 0 : i32
    return %c0_i32, %c0_i32_0 : i32, i32
  }
  func.func @transform_6(%arg0: i32) -> (i32, i32) {
    %c0_i32 = arith.constant 0 : i32
    %c0_i32_0 = arith.constant 0 : i32
    %c0_i32_1 = arith.constant 0 : i32
    return %c0_i32, %c0_i32_0 : i32, i32
  }
  func.func @transform_7(%arg0: i32) -> (i32, i32) {
    %c0_i32 = arith.constant 0 : i32
    %c0_i32_0 = arith.constant 0 : i32
    %c0_i32_1 = arith.constant 0 : i32
    return %c0_i32, %c0_i32_0 : i32, i32
  }
  func.func @transform_8(%arg0: i32) -> (i32, i32) {
    %c0_i32 = arith.constant 0 : i32
    %c0_i32_0 = arith.constant 0 : i32
    %c0_i32_1 = arith.constant 0 : i32
    return %c0_i32, %c0_i32_0 : i32, i32
  }
  func.func @transform_9(%arg0: i32) -> (i32, i32) {
    %c0_i32 = arith.constant 0 : i32
    %c0_i32_0 = arith.constant 0 : i32
    %c0_i32_1 = arith.constant 0 : i32
    return %c0_i32, %c0_i32_0 : i32, i32
  }
  func.func @transform_10(%arg0: i32) -> (i32, i32) {
    %c0_i32 = arith.constant 0 : i32
    %c0_i32_0 = arith.constant 0 : i32
    return %arg0, %c0_i32 : i32, i32
  }
}

</mosaic_0001>

<bundles_post_ra>
// kernel: actor_forward.1
= control target key start
LH: loop header
LB: loop body
LE: loop exit
PB: predicated region body
PF: predicated region fallthrough
CT: control target
= control target key end

     0   :  { %s726_s0 = inlined_call_operand.vmem [shape: f32[8,13], index: 0, kind: input, shape index: {}]   ;;  %s727_s1 = inlined_call_operand.hbm [shape: f32[13,32], index: 1, kind: input, shape index: {}]   ;;  %s728_s2 = inlined_call_operand.vmem [shape: f32[1,32], index: 2, kind: input, shape index: {}]   ;;  %s729_s3 = inlined_call_operand.vmem [shape: f32[32,32], index: 3, kind: input, shape index: {}]   ;;  %s730_s4 = inlined_call_operand.hbm [shape: f32[1,32], index: 4, kind: input, shape index: {}]   ;;  %s731_s5 = inlined_call_operand.vmem [shape: f32[32,32], index: 5, kind: input, shape index: {}]   ;;  %s732_s6 = inlined_call_operand.vmem [shape: f32[1,32], index: 6, kind: input, shape index: {}]   ;;  %s733_s7 = inlined_call_operand.vmem [shape: f32[32,4], index: 7, kind: input, shape index: {}]   ;;  %s734_s8 = inlined_call_operand.vmem [shape: f32[1,4], index: 8, kind: input, shape index: {}]   ;;  %s735_s9 = inlined_call_operand.<no memory space> [shape: f32[1,1], index: 9, kind: input, shape index: {}]   ;;  %s736_s10 = inlined_call_operand.vmem [shape: f32[8,4], index: 10, kind: output, shape index: {}]  }
   0x1   :  { %v15_v0 = vstv %s735_s9 }
   0x2   :  { %16 = vst [vmem:[#allocation2] sm:$0x1] %v15_v0 }
   0x3   :  { %17 = vsyncpa [#allocation4], 0 }
   0x4   :  { %18 = vsyncpa [#allocation6], 0  ;;  %s577_s15 = smov [#allocation3]   ;;  %s529_s19 = scalar_lea.hbm %s727_s1, 256 }
   0x5   :  { %s26_s16 = sshll.u32 %s577_s15, 4  ;;  %p530_p0 = scmp.ne.s32.totalorder %s727_s1, %s529_s19  ;;  %s27_s16 = int_to_ptr.vmem [resolvable:$true] %s26_s16 }
   0x6   :  { %p533_p1 = scmp.lt.u32.totalorder %s529_s19, %s727_s1 }
   0x8   :  { %p535_p2 = pnand %p533_p1, %p530_p0 }
   0xa   :  { %538 = shalt.err (!%p535_p2)
}
   0xb   :  { %s539_s9 = scalar_lea.vmem %s27_s16, 256  ;;  %p544_p4 = scmp.lt.s32.totalorder %s27_s16, %s27_s16 }
   0xc   :  { %p540_p3 = scmp.ne.s32.totalorder %s27_s16, %s539_s9  ;;  %p545_p5 = scmp.lt.s32.totalorder %s539_s9, %s539_s9 }
   0xe   :  { %p546_p6 = por %p545_p5, %p544_p4 }
  0x10   :  { %p547_p7 = pnand %p546_p6, %p540_p3 }
  0x12   :  { %550 = shalt.err (!%p547_p7)
}
  0x13   :  { %s578_s24 = smov 128   ;;  %s579_s25 = smov 8  }
  0x14   :  { %32 = dma.hbm_to_vmem [thread:$0]  %s727_s1, 256, %s27_s16, [#allocation4], %s578_s24, %s578_s24, %s579_s25  }
  0x15   :  { %s580_s28 = smov [#allocation5]   ;;  %s551_s12 = scalar_lea.hbm %s730_s4, 16 }
  0x16   :  { %s43_s29 = sshll.u32 %s580_s28, 4  ;;  %p552_p8 = scmp.ne.s32.totalorder %s730_s4, %s551_s12  ;;  %s44_s29 = int_to_ptr.vmem [resolvable:$true] %s43_s29 }
  0x17   :  { %p555_p9 = scmp.lt.u32.totalorder %s551_s12, %s730_s4 }
  0x19   :  { %p557_p10 = pnand %p555_p9, %p552_p8 }
  0x1b   :  { %560 = shalt.err (!%p557_p10)
}
  0x1c   :  { %s561_s18 = scalar_lea.vmem %s44_s29, 16  ;;  %s565_s1 = scalar_lea.vmem %s44_s29, 32 }
  0x1d   :  { %p562_p11 = scmp.ne.s32.totalorder %s44_s29, %s561_s18  ;;  %p566_p12 = scmp.lt.s32.totalorder %s44_s29, %s44_s29 }
  0x1e   :  { %p567_p13 = scmp.lt.s32.totalorder %s565_s1, %s561_s18 }
  0x20   :  { %p568_p0 = por %p567_p13, %p566_p12 }
  0x22   :  { %p569_p1 = pnand %p568_p0, %p562_p11 }
  0x24   :  { %572 = shalt.err (!%p569_p1)
}
  0x25   :  { %46 = dma.hbm_to_vmem [thread:$0]  %s730_s4, 16, %s44_s29, [#allocation6]  }
  0x26   :  { %573 = dma.done.wait [#allocation4], 256  }
  0x27   :  { %574 = vsyncadd [#allocation4], 4294967040 }
  0x28   :  { %575 = dma.done.wait [#allocation6], 16  }
  0x29   :  { %576 = vsyncadd [#allocation6], 4294967280  ;;  %v581_v1 = vmov 0.0|0.0   ;;  %vm582_vm0 = vmmov 0   ;;  %v583_v2 = vmov 0.0   ;;  %vm77_vm1 = vcmask 1044480  }
  0x2a   :  { %495 = vmatprep.subr.bf16.mxu0 %v581_v1  ;;  %499 = vmatprep.subr.bf16.mxu1 %v581_v1  ;;  %v64_v3 = vld [vmem:[#allocation3] sm:$0xff]  ;;  %v65_v4 = vld [vmem:[#allocation3 + $0x8] sm:$0x1f]  ;;  %vm584_vm2 = vmmov 1   ;;  %vm73_vm4 = vcmask 105472   ;;  %v154_v10 = vld [vmem:[%s729_s3 + $0x10] sm:$0xff] }
  0x2b   :  { %459 = vmatprep.mubr.msk.f32.mxu0 %vm582_vm0, %v583_v2  ;;  %470 = vmatprep.mubr.msk.f32.mxu1 %vm582_vm0, %v583_v2  ;;  %vm497_vm3 = vmpackc.low %vm77_vm1, %vm584_vm2  ;;  %v496_v5 = vpack.c.bf16 %v65_v4, %v64_v3  ;;  %v152_v6 = vld [vmem:[%s729_s3] sm:$0xff]  ;;  %v153_v7 = vld [vmem:[%s729_s3 + $0x8] sm:$0xff]  ;;  %vm163_vm5 = vcmask 261120   ;;  %v585_v36 = vmov 0   ;;  %vm419_vm6 = vcmask 31744  }
  0x2c   :  { %v500_v8 = vpack.c.bf16 %v153_v7, %v152_v6  ;;  %v63_v9 = vld [vmem:[%s726_s0] sm:$0xff]  ;;  %v155_v11 = vld [vmem:[%s729_s3 + $0x18] sm:$0xff]  ;;  %v239_v14 = vld [vmem:[%s731_s5 + $0x8] sm:$0xff]  ;;  %526 = vset.pattern.permute.xlu0 %v585_v36 }
  0x2d   :  { %498 = vmatpush3.bf16.msk.msra.mxu0 %vm497_vm3, %v496_v5  ;;  %v503_v12 = vpack.c.bf16 %v155_v11, %v154_v10  ;;  %v238_v13 = vld [vmem:[%s731_s5] sm:$0xff]  ;;  %v240_v21 = vld [vmem:[%s731_s5 + $0x10] sm:$0xff]  ;;  %v241_v22 = vld [vmem:[%s731_s5 + $0x18] sm:$0xff] }
  0x2e   :  { %501 = vmatpush3.bf16.msra.mxu1 %v500_v8  ;;  %505 = vmatprep.subr.bf16.mxu0 %v581_v1  ;;  %v506_v15 = vpack.c.bf16 %v239_v14, %v238_v13  ;;  %v427_v16 = vld [vmem:[%s728_s2] ss:$0 sm:$0xff]  ;;  %v509_v23 = vpack.c.bf16 %v241_v22, %v240_v21  ;;  %v324_v25 = vld [vmem:[%s733_s7 + $0x8] sm:$0xff]  ;;  %v430_v27 = vld [vmem:[#allocation5] ss:$0 sm:$0xff] }
  0x2f   :  { %502 = vmatprep.subr.bf16.mxu1 %v581_v1  ;;  %v323_v24 = vld [vmem:[%s733_s7] sm:$0xff]  ;;  %v325_v32 = vld [vmem:[%s733_s7 + $0x10] sm:$0xff]  ;;  %v326_v33 = vld [vmem:[%s733_s7 + $0x18] sm:$0xff] }
  0x30   :  { %460 = vmatmul.mubr.msk.f32.vlgmr.msra.gmra.mrb[0].mxu0 %vm73_vm4, %v63_v9  ;;  %v512_v26 = vpack.c.bf16 %v324_v25, %v323_v24  ;;  %v515_v34 = vpack.c.bf16 %v326_v33, %v325_v32  ;;  %v436_v35 = vld [vmem:[#allocation2] ss:$0 sm:$0xff] }
  0x31   :  { %481 = vmatprep.mubr.msk.f32.mxu0 %vm582_vm0, %v583_v2  ;;  %507 = vmatpush3.bf16.msra.mxu0 %v506_v15  ;;  %v432_v37 = vld [vmem:[%s732_s6] ss:$0 sm:$0xff] }
  0x32   :  { %504 = vmatpush3.bf16.msra.mxu1 %v503_v12  ;;  %508 = vmatprep.subr.bf16.mxu0 %v581_v1  ;;  %v434_v42 = vld [vmem:[%s734_s8] ss:$0 sm:$0xff] }
  0x33   :  { %511 = vmatprep.subr.bf16.mxu1 %v581_v1  ;;  %415 = vperm.xlu0 %526, %v436_v35  }
  0x35   :  { %510 = vmatpush3.bf16.msra.mxu0 %v509_v23 }
  0xb2   :  { %v416_v46 = vpop.permute.xlu0 %415 }
 0x103   :  { %v147_v17 = vpop.f32.mrb[0].mxu0 }
 0x104   :  { %v148_v18 = vadd.f32 %v427_v16, %v147_v17  ;;  %v461_v19 = vpop.f32.mrb[1].mxu0 }
 0x106   :  { %v151_v20 = vmax.f32 %v148_v18, 0.0 }
 0x108   :  { %471 = vmatmul.mubr.msk.f32.vlgmr.msra.gmra.mrb[0].mxu1 %vm163_vm5, %v151_v20 }
 0x109   :  { %492 = vmatprep.mubr.msk.f32.mxu1 %vm582_vm0, %v583_v2  ;;  %513 = vmatpush3.bf16.msra.mxu1 %v512_v26 }
 0x10a   :  { %514 = vmatprep.subr.bf16.mxu1 %v581_v1 }
 0x10d   :  { %516 = vmatpush3.bf16.msra.mxu1 %v515_v34 }
 0x1db   :  { %v233_v28 = vpop.f32.mrb[0].mxu1 }
 0x1dc   :  { %v234_v29 = vadd.f32 %v430_v27, %v233_v28  ;;  %v472_v30 = vpop.f32.mrb[1].mxu1 }
 0x1de   :  { %v237_v31 = vmax.f32 %v234_v29, 0.0 }
 0x1e0   :  { %482 = vmatmul.mubr.msk.f32.vlgmr.msra.gmra.mrb[2].mxu0 %vm163_vm5, %v237_v31 }
 0x2b3   :  { %v318_v38 = vpop.f32.mrb[2].mxu0 }
 0x2b4   :  { %v319_v39 = vadd.f32 %v432_v37, %v318_v38  ;;  %v483_v40 = vpop.f32.mrb[3].mxu0 }
 0x2b6   :  { %v322_v41 = vmax.f32 %v319_v39, 0.0 }
 0x2b8   :  { %493 = vmatmul.mubr.msk.f32.vlgmr.msra.gmra.mrb[2].mxu1 %vm163_vm5, %v322_v41 }
 0x38b   :  { %v403_v43 = vpop.f32.mrb[2].mxu1 }
 0x38c   :  { %v404_v44 = vadd.f32 %v434_v42, %v403_v43  ;;  %v494_v45 = vpop.f32.mrb[3].mxu1 }
 0x38e   :  { %527 = vtanh.f32 %v404_v44 }
 0x398   :  { %v528_v47 = vpop.eup %527 }
 0x399   :  { %v418_v48 = vmul.f32 %v528_v47, %v416_v46 }
 0x39b   :  { %420 = vst.msk [vmem:[%s736_s10] sm:$0xff] %vm419_vm6, %v418_v48 }
 0x39c   :  { %425 = vsyncpa [#allocation4], 1 }
 0x39d   :  { %426 = vsyncpa [#allocation6], 1 }

</bundles_post_ra>
